<compile_context>
chip_gen: v5e
topology: v5e:2x2
jax: 0.10.0
libtpu: 0.0.40
codegen_flags: <defaults>
</compile_context>

<pallas_src>
import math

import jax
import jax.numpy as jnp
from jax.experimental import pallas as pl
from jax.experimental.pallas import tpu as pltpu


def _round_up(a: int, b: int) -> int:
    return (a + b - 1) // b * b


# ----------------------------------------------------------------------------
# Kernels
# ----------------------------------------------------------------------------

def ffn_kernel_resident(x_ref, w1_ref, b1_ref, w2_ref, b2_ref, o_ref):
    """Weights-resident fast path.  grid = (row tiles,).

    x_ref : (tm, d_in)     w1_ref: (d_in, d_ff)   b1_ref: (1, d_ff)
    w2_ref: (d_ff, d_out)  b2_ref: (1, d_out)     o_ref : (tm, d_out)
    Weight BlockSpecs are grid-invariant -> DMA'd once for the whole call.
    """
    h = jnp.dot(x_ref[...], w1_ref[...], preferred_element_type=jnp.float32)
    h = jnp.maximum(h + b1_ref[...].astype(jnp.float32), 0.0)
    # (Dropout would apply here; identity in eval / p=0.0.)
    acc = jnp.dot(h.astype(w2_ref.dtype), w2_ref[...],
                  preferred_element_type=jnp.float32)
    o_ref[...] = (acc + b2_ref[...].astype(jnp.float32)).astype(o_ref.dtype)


def ffn_kernel_tiled(x_ref, w1_ref, b1_ref, w2_ref, b2_ref, o_ref, acc_ref):
    """Tiled d_ff reduction path.  grid = (row tiles, d_ff tiles).

    x_ref  : (tm, d_in)      -- same block for every k (row tile)
    w1_ref : (d_in, tk)      -- k-th column tile of W1
    b1_ref : (1,  tk)
    w2_ref : (tk, d_out)     -- k-th row tile of W2
    b2_ref : (1,  d_out)
    o_ref  : (tm, d_out)     -- written only on the last k step (lane-dense)
    acc_ref: VMEM (tm, d_out) f32 accumulator, persists across the k axis
    """
    k = pl.program_id(1)

    @pl.when(k == 0)
    def _init():
        # Fold b2 into the accumulator init -> finalize is just a cast+store.
        acc_ref[...] = jnp.broadcast_to(
            b2_ref[...].astype(jnp.float32), acc_ref.shape)

    # Linear1 (+bias) and ReLU for this d_ff tile; f32 accumulation on the MXU.
    h = jnp.dot(x_ref[...], w1_ref[...], preferred_element_type=jnp.float32)
    h = jnp.maximum(h + b1_ref[...].astype(jnp.float32), 0.0)
    # (Dropout would apply here; identity in eval / p=0.0.)

    # Linear2 partial product over this d_ff tile, accumulated in f32.
    acc_ref[...] += jnp.dot(h.astype(w2_ref.dtype), w2_ref[...],
                            preferred_element_type=jnp.float32)

    @pl.when(k == pl.num_programs(1) - 1)
    def _finalize():
        o_ref[...] = acc_ref[...].astype(o_ref.dtype)


# ----------------------------------------------------------------------------
# Tiling / VMEM budgeting helpers
# ----------------------------------------------------------------------------

_MIB = 1 << 20


def _default_vmem_limit() -> int:
    """Generation-aware scoped-VMEM limit (physical capacity minus headroom)."""
    cap = None
    try:
        cap = getattr(pltpu.get_tpu_info(), "vmem_capacity_bytes", None)
    except Exception:
        cap = None
    if not cap:
        try:
            kind = jax.devices()[0].device_kind.lower()
        except Exception:
            kind = ""
        cap = 64 * _MIB if "v7" in kind else 128 * _MIB  # v7x: 64 MiB per TC
    # Leave headroom for compiler-internal scratch (~1/8 of capacity, >=8 MiB).
    return int(cap - max(cap // 8, 8 * _MIB))


def _choose_tm(M: int, tm_max: int) -> int:
    """Pick a row tile: biggest that fits, but avoid large padding waste."""
    tm_max = max(8, (tm_max // 8) * 8)
    if M <= tm_max:
        return _round_up(M, 8)           # single row tile, no waste
    cands = []
    c = tm_max
    while c >= 128:
        cands.append(c)                  # descending: largest first
        c //= 2
    if not cands:
        cands = [tm_max]
    frac = {c: (_round_up(M, c) - M) / M for c in cands}
    best = min(frac.values())
    for c in cands:                      # largest tile within 10% of min waste
        if frac[c] <= best + 0.10:
            return c
    return cands[-1]


def _choose_tk(d_ff: int, tk_max: int):
    """Pick the d_ff tile.  Prefer a 128-multiple divisor of d_ff so the
    weight matrices never need a per-call jnp.pad (HBM->HBM copy)."""
    if d_ff <= tk_max:
        return d_ff, d_ff
    t = (tk_max // 128) * 128
    while t >= 128:
        if d_ff % t == 0:
            return t, d_ff
        t -= 128
    # No suitable divisor: fall back to padding.
    # TODO(synk): pad the stored parameters once outside the hot path instead.
    tk = max(128, (tk_max // 128) * 128)
    return tk, _round_up(d_ff, tk)


def _resident_footprint(tm, d_in, d_ff, d_out, xb, wb, ob):
    w = (d_in * d_ff + d_ff + d_ff * d_out + d_out) * wb
    return 2 * (tm * d_in * xb + tm * d_out * ob) + 2 * w


def _tiled_footprint(tm, tk, d_in, d_out, xb, wb, ob):
    ins = tm * d_in * xb + (d_in * tk + tk + tk * d_out + d_out) * wb
    outs = tm * d_out * ob
    acc = tm * d_out * 4
    return 2 * (ins + outs) + acc


# ----------------------------------------------------------------------------
# Wrapper
# ----------------------------------------------------------------------------

def feed_forward(x, params, *, tm=None, tk=None, vmem_limit_bytes=None):
    """x: (..., d_in).  params: dict(w1 (d_in,d_ff), b1 (1,d_ff),
                                     w2 (d_ff,d_out), b2 (1,d_out))."""
    w1, b1, w2, b2 = params["w1"], params["b1"], params["w2"], params["b2"]
    d_in, d_ff = w1.shape
    d_out = w2.shape[1]
    assert x.shape[-1] == d_in

    lead_shape = x.shape[:-1]
    x2 = x.reshape(-1, d_in)
    M = x2.shape[0]

    xb = jnp.dtype(x.dtype).itemsize
    wb = jnp.dtype(w1.dtype).itemsize
    ob = xb

    if vmem_limit_bytes is None:
        vmem_limit_bytes = _default_vmem_limit()
    vmem_limit_bytes = int(vmem_limit_bytes)
    budget = int(vmem_limit_bytes * 0.9)     # tile footprint budget w/ margin

    tm_req = 512 if tm is None else tm       # raised default (roofline)
    tm_eff = _choose_tm(M, tm_req)

    # ---------------- weights-resident single-k fast path -------------------
    want_full_k = (tk is None) or (tk >= d_ff)
    use_resident = want_full_k and (
        _resident_footprint(tm_eff, d_in, d_ff, d_out, xb, wb, ob) <= budget)

    if use_resident:
        M_pad = _round_up(M, tm_eff)
        if M_pad != M:
            x2 = jnp.pad(x2, ((0, M_pad - M), (0, 0)))
        grid = (M_pad // tm_eff,)
        out = pl.pallas_call(
            ffn_kernel_resident,
            out_shape=jax.ShapeDtypeStruct((M_pad, d_out), x.dtype),
            grid=grid,
            in_specs=[
                pl.BlockSpec((tm_eff, d_in), lambda i: (i, 0)),   # x rows
                pl.BlockSpec((d_in, d_ff),   lambda i: (0, 0)),   # W1 (resident)
                pl.BlockSpec((1, d_ff),      lambda i: (0, 0)),   # b1
                pl.BlockSpec((d_ff, d_out),  lambda i: (0, 0)),   # W2 (resident)
                pl.BlockSpec((1, d_out),     lambda i: (0, 0)),   # b2
            ],
            out_specs=pl.BlockSpec((tm_eff, d_out), lambda i: (i, 0)),
            compiler_params=pltpu.CompilerParams(
                dimension_semantics=("parallel",),
                vmem_limit_bytes=vmem_limit_bytes),
        )(x2, w1, b1, w2, b2)
        return out[:M].reshape(lead_shape + (d_out,))

    # ---------------- tiled d_ff (reduction) path ----------------------------
    if want_full_k:
        # Weights don't fit resident: pick a tk from the VMEM generation.
        tk = 1024 if budget >= 96 * _MIB else 512
    tk_eff, d_ff_pad = _choose_tk(d_ff, tk)

    # Shrink tiles until the double-buffered footprint fits the budget.
    while (_tiled_footprint(tm_eff, tk_eff, d_in, d_out, xb, wb, ob) > budget
           and tm_eff > 128):
        tm_eff = max(128, tm_eff // 2)
    while (_tiled_footprint(tm_eff, tk_eff, d_in, d_out, xb, wb, ob) > budget
           and tk_eff > 256):
        tk_eff, d_ff_pad = _choose_tk(d_ff, tk_eff // 2)

    if d_ff_pad != d_ff:
        # Zero-padding d_ff is numerically exact (zeros survive bias-free
        # padded columns, ReLU, and zero W2 rows).
        pad = d_ff_pad - d_ff
        w1 = jnp.pad(w1, ((0, 0), (0, pad)))
        b1 = jnp.pad(b1, ((0, 0), (0, pad)))
        w2 = jnp.pad(w2, ((0, pad), (0, 0)))

    M_pad = _round_up(M, tm_eff)
    if M_pad != M:
        x2 = jnp.pad(x2, ((0, M_pad - M), (0, 0)))

    grid = (M_pad // tm_eff, d_ff_pad // tk_eff)

    out = pl.pallas_call(
        ffn_kernel_tiled,
        out_shape=jax.ShapeDtypeStruct((M_pad, d_out), x.dtype),
        grid=grid,
        in_specs=[
            pl.BlockSpec((tm_eff, d_in),  lambda i, k: (i, 0)),   # x rows
            pl.BlockSpec((d_in, tk_eff),  lambda i, k: (0, k)),   # W1 col tile
            pl.BlockSpec((1, tk_eff),     lambda i, k: (0, k)),   # b1 tile
            pl.BlockSpec((tk_eff, d_out), lambda i, k: (k, 0)),   # W2 row tile
            pl.BlockSpec((1, d_out),      lambda i, k: (0, 0)),   # b2
        ],
        out_specs=pl.BlockSpec((tm_eff, d_out), lambda i, k: (i, 0)),
        scratch_shapes=[pltpu.VMEM((tm_eff, d_out), jnp.float32)],
        compiler_params=pltpu.CompilerParams(
            dimension_semantics=("parallel", "arbitrary"),
            vmem_limit_bytes=vmem_limit_bytes),
    )(x2, w1, b1, w2, b2)

    return out[:M].reshape(lead_shape + (d_out,))


# ----------------------------------------------------------------------------
# Parameter init (torch.nn.Linear-style uniform bounds), W stored (in, out)
# ----------------------------------------------------------------------------

def init_linear(key, d_in, d_out, dtype=jnp.float32):
    k1, k2 = jax.random.split(key)
    bound = 1.0 / math.sqrt(d_in)
    w = jax.random.uniform(k1, (d_in, d_out), jnp.float32, -bound, bound)
    b = jax.random.uniform(k2, (1, d_out), jnp.float32, -bound, bound)
    return w.astype(dtype), b.astype(dtype)


def init_feed_forward(key, d_out, d_ff, dtype=jnp.float32):
    k1, k2 = jax.random.split(key)
    w1, b1 = init_linear(k1, d_out, d_ff, dtype)
    w2, b2 = init_linear(k2, d_ff, d_out, dtype)
    return dict(w1=w1, b1=b1, w2=w2, b2=b2)


def _reference(x, p):
    x2 = x.reshape(-1, x.shape[-1]).astype(jnp.float32)
    h = jnp.maximum(x2 @ p["w1"].astype(jnp.float32)
                    + p["b1"].astype(jnp.float32), 0.0)
    y = h @ p["w2"].astype(jnp.float32) + p["b2"].astype(jnp.float32)
    return y.reshape(x.shape[:-1] + (p["w2"].shape[1],))


# ----------------------------------------------------------------------------

if __name__ == "__main__":
    key = jax.random.PRNGKey(0)

    # ---- small test (module-implied shapes): batch=2, seq=8, d_out=32, d_ff=64
    # Exercises the weights-resident single-k fast path.
    d_out, d_ff, B, T = 32, 64, 2, 8
    k_p, k_x, k_p2, k_x2, k_x3 = jax.random.split(key, 5)
    params = init_feed_forward(k_p, d_out, d_ff)
    x = jax.random.normal(k_x, (B, T, d_out), jnp.float32)

    y = jax.block_until_ready(feed_forward(x, params))
    ref = _reference(x, params)
    assert y.shape == (B, T, d_out)
    assert jnp.allclose(y, ref, atol=2e-2, rtol=2e-2)

    # bf16 weights/activations, f32 accumulation (recommended MXU path)
    params_bf16 = jax.tree_util.tree_map(lambda a: a.astype(jnp.bfloat16), params)
    y_bf16 = jax.block_until_ready(
        feed_forward(x.astype(jnp.bfloat16), params_bf16))
    assert y_bf16.dtype == jnp.bfloat16
    assert jnp.allclose(y_bf16.astype(jnp.float32), ref, atol=1e-1, rtol=1e-1)

    # ---- test exercising the tiled multi-k reduction path (explicit tk < d_ff)
    d_out2, d_ff2, B2, T2 = 128, 1024, 4, 128          # grid = (2, 2)
    params2 = init_feed_forward(k_p2, d_out2, d_ff2)
    x2 = jax.random.normal(k_x2, (B2, T2, d_out2), jnp.float32)
    y2 = jax.block_until_ready(feed_forward(x2, params2, tm=256, tk=512))
    assert jnp.allclose(y2, _reference(x2, params2), atol=2e-2, rtol=2e-2)

    # ---- ragged row count (exercises row padding path)
    x3 = jax.random.normal(k_x3, (3, 5, d_out), jnp.float32)   # M = 15 rows
    y3 = jax.block_until_ready(feed_forward(x3, params))
    assert y3.shape == (3, 5, d_out)
    assert jnp.allclose(y3, _reference(x3, params), atol=2e-2, rtol=2e-2)

    print("KERNEL_OK")
</pallas_src>

<mosaic_0001>
module attributes {stable_mosaic.version = 11 : i64} {
  func.func @ffn_kernel_resident(%arg0: i32, %arg1: memref<16x32xf32, #tpu.memory_space<vmem>>, %arg2: memref<32x64xf32, #tpu.memory_space<vmem>>, %arg3: memref<1x64xf32, #tpu.memory_space<vmem>>, %arg4: memref<64x32xf32, #tpu.memory_space<vmem>>, %arg5: memref<1x32xf32, #tpu.memory_space<vmem>>, %arg6: memref<16x32xf32, #tpu.memory_space<vmem>>) attributes {dimension_semantics = [#tpu.dimension_semantics<parallel>], iteration_bounds = array<i64: 1>, scalar_prefetch = 0 : i64, scratch_operands = 0 : i64, tpu.core_type = #tpu.core_type<tc>, window_params = [{transform_indices = @transform_0, window_bounds = array<i64: 16, 32>}, {pipeline_mode = #tpu.pipeline_mode<synchronous>, transform_indices = @transform_1, window_bounds = array<i64: 32, 64>}, {pipeline_mode = #tpu.pipeline_mode<synchronous>, transform_indices = @transform_2, window_bounds = array<i64: 1, 64>}, {pipeline_mode = #tpu.pipeline_mode<synchronous>, transform_indices = @transform_3, window_bounds = array<i64: 64, 32>}, {pipeline_mode = #tpu.pipeline_mode<synchronous>, transform_indices = @transform_4, window_bounds = array<i64: 1, 32>}, {transform_indices = @transform_5, window_bounds = array<i64: 16, 32>}]} {
    %c0 = arith.constant 0 : index
    %c0_0 = arith.constant 0 : index
    %0 = vector.load %arg1[%c0, %c0_0] : memref<16x32xf32, #tpu.memory_space<vmem>>, vector<16x32xf32>
    %c0_1 = arith.constant 0 : index
    %c0_2 = arith.constant 0 : index
    %1 = vector.load %arg2[%c0_1, %c0_2] : memref<32x64xf32, #tpu.memory_space<vmem>>, vector<32x64xf32>
    %cst = arith.constant dense<0.000000e+00> : vector<16x64xf32>
    %2 = tpu.matmul %0, %1, %cst {dimension_numbers = #tpu.dot_dimension_numbers<[1], [0], [0], [1], [0, 0, 1, 1], [], []>} : vector<16x32xf32>, vector<32x64xf32>, vector<16x64xf32> -> vector<16x64xf32>
    %c0_3 = arith.constant 0 : index
    %c0_4 = arith.constant 0 : index
    %3 = vector.load %arg3[%c0_3, %c0_4] : memref<1x64xf32, #tpu.memory_space<vmem>>, vector<1x64xf32>
    %4 = vector.broadcast %3 : vector<1x64xf32> to vector<16x64xf32>
    %5 = arith.addf %2, %4 : vector<16x64xf32>
    %cst_5 = arith.constant 0.000000e+00 : f32
    %6 = vector.broadcast %cst_5 : f32 to vector<16x64xf32>
    %7 = arith.maximumf %5, %6 : vector<16x64xf32>
    %c0_6 = arith.constant 0 : index
    %c0_7 = arith.constant 0 : index
    %8 = vector.load %arg4[%c0_6, %c0_7] : memref<64x32xf32, #tpu.memory_space<vmem>>, vector<64x32xf32>
    %cst_8 = arith.constant dense<0.000000e+00> : vector<16x32xf32>
    %9 = tpu.matmul %7, %8, %cst_8 {dimension_numbers = #tpu.dot_dimension_numbers<[1], [0], [0], [1], [0, 0, 1, 1], [], []>} : vector<16x64xf32>, vector<64x32xf32>, vector<16x32xf32> -> vector<16x32xf32>
    %c0_9 = arith.constant 0 : index
    %c0_10 = arith.constant 0 : index
    %10 = vector.load %arg5[%c0_9, %c0_10] : memref<1x32xf32, #tpu.memory_space<vmem>>, vector<1x32xf32>
    %11 = vector.broadcast %10 : vector<1x32xf32> to vector<16x32xf32>
    %12 = arith.addf %9, %11 : vector<16x32xf32>
    %c0_11 = arith.constant 0 : index
    %c0_12 = arith.constant 0 : index
    %13 = vector.load %arg6[%c0_11, %c0_12] : memref<16x32xf32, #tpu.memory_space<vmem>>, vector<16x32xf32>
    tpu.vector_store %arg6[%c0_11, %c0_12], %12 {strides = array<i32>} : memref<16x32xf32, #tpu.memory_space<vmem>>, vector<16x32xf32>,
    return
  }
  func.func @transform_0(%arg0: i32) -> (i32, i32) {
    %c0_i32 = arith.constant 0 : i32
    %c0_i32_0 = arith.constant 0 : i32
    return %arg0, %c0_i32 : i32, i32
  }
  func.func @transform_1(%arg0: i32) -> (i32, i32) {
    %c0_i32 = arith.constant 0 : i32
    %c0_i32_0 = arith.constant 0 : i32
    %c0_i32_1 = arith.constant 0 : i32
    return %c0_i32, %c0_i32_0 : i32, i32
  }
  func.func @transform_2(%arg0: i32) -> (i32, i32) {
    %c0_i32 = arith.constant 0 : i32
    %c0_i32_0 = arith.constant 0 : i32
    %c0_i32_1 = arith.constant 0 : i32
    return %c0_i32, %c0_i32_0 : i32, i32
  }
  func.func @transform_3(%arg0: i32) -> (i32, i32) {
    %c0_i32 = arith.constant 0 : i32
    %c0_i32_0 = arith.constant 0 : i32
    %c0_i32_1 = arith.constant 0 : i32
    return %c0_i32, %c0_i32_0 : i32, i32
  }
  func.func @transform_4(%arg0: i32) -> (i32, i32) {
    %c0_i32 = arith.constant 0 : i32
    %c0_i32_0 = arith.constant 0 : i32
    %c0_i32_1 = arith.constant 0 : i32
    return %c0_i32, %c0_i32_0 : i32, i32
  }
  func.func @transform_5(%arg0: i32) -> (i32, i32) {
    %c0_i32 = arith.constant 0 : i32
    %c0_i32_0 = arith.constant 0 : i32
    return %arg0, %c0_i32 : i32, i32
  }
}

</mosaic_0001>

<bundles_post_ra>
// kernel: tpu_custom_call.1
= control target key start
LH: loop header
LB: loop body
LE: loop exit
PB: predicated region body
PF: predicated region fallthrough
CT: control target
= control target key end

     0   :  { %s260_s0 = inlined_call_operand.vmem [shape: f32[16,32], index: 0, kind: input, shape index: {}]   ;;  %s261_s1 = inlined_call_operand.vmem [shape: f32[32,64], index: 1, kind: input, shape index: {}]   ;;  %s262_s2 = inlined_call_operand.vmem [shape: f32[1,64], index: 2, kind: input, shape index: {}]   ;;  %s263_s3 = inlined_call_operand.vmem [shape: f32[64,32], index: 3, kind: input, shape index: {}]   ;;  %s264_s4 = inlined_call_operand.vmem [shape: f32[1,32], index: 4, kind: input, shape index: {}]   ;;  %s265_s5 = inlined_call_operand.hbm [shape: f32[16,32], index: 5, kind: output, shape index: {}]  }
   0x1   :  { %v26_v0 = vld [vmem:[%s261_s1 + $0x18] sm:$0xff]  ;;  %v25_v1 = vld [vmem:[%s261_s1 + $0x10] sm:$0xff]  ;;  %v24_v2 = vld [vmem:[%s261_s1 + $0x8] sm:$0xff] }
   0x2   :  { %129 = vmatpush.msra.mxu3 %v26_v0  ;;  %50 = vmatpush.msra.mxu0 %v26_v0  ;;  %v70_v3 = vld [vmem:[%s263_s3 + $0x38] sm:$0xff]  ;;  %v69_v4 = vld [vmem:[%s263_s3 + $0x30] sm:$0xff]  ;;  %v23_v5 = vld [vmem:[%s261_s1] sm:$0xff] }
   0x3   :  { %133 = vmatpush.msra.mxu2 %v70_v3  ;;  %90 = vmatpush.msra.mxu1 %v70_v3 }
   0x4   :  { %130 = vmatpush.msra.mxu3 %v25_v1  ;;  %51 = vmatpush.msra.mxu0 %v25_v1 }
   0x5   :  { %10 = vsyncpa [#allocation3], 0  ;;  %v22_v6 = vld [vmem:[%s260_s0 + $0x8] sm:$0xff]  ;;  %vm31_vm0 = vcmask 261120   ;;  %v21_v7 = vld [vmem:[%s260_s0] sm:$0xff]  ;;  %134 = vmatpush.msra.mxu2 %v69_v4  ;;  %91 = vmatpush.msra.mxu1 %v69_v4  ;;  %vm75_vm1 = vcmask 523264  }
   0x6   :  { %131 = vmatpush.msra.mxu3 %v24_v2  ;;  %52 = vmatpush.msra.mxu0 %v24_v2  ;;  %v68_v8 = vld [vmem:[%s263_s3 + $0x28] sm:$0xff]  ;;  %v67_v9 = vld [vmem:[%s263_s3 + $0x20] sm:$0xff]  ;;  %v66_v10 = vld [vmem:[%s263_s3 + $0x18] sm:$0xff]  ;;  %s113_s25 = sshll.u32 %s265_s5, 4  ;;  %s173_s26 = smov 128   ;;  %s114_s25 = int_to_ptr.hbm [resolvable:$true] %s113_s25 }
   0x7   :  { %135 = vmatpush.msra.mxu2 %v68_v8  ;;  %92 = vmatpush.msra.mxu1 %v68_v8  ;;  %v65_v11 = vld [vmem:[%s263_s3 + $0x10] sm:$0xff]  ;;  %v64_v12 = vld [vmem:[%s263_s3 + $0x8] sm:$0xff]  ;;  %v63_v13 = vld [vmem:[%s263_s3] sm:$0xff]  ;;  %s172_s3 = smov [#allocation2]   ;;  %s174_s27 = smov 8  }
   0x8   :  { %132 = vmatpush.msra.mxu3 %v23_v5  ;;  %53 = vmatpush.msra.mxu0 %v23_v5  ;;  %v144_v14 = vld [vmem:[%s262_s2] ss:$0 sm:$0xff]  ;;  %s111_s23 = sshll.u32 %s172_s3, 4  ;;  %s112_s23 = int_to_ptr.vmem [resolvable:$true] %s111_s23 }
   0x9   :  { %126 = vmatmul.msk.f32.vlgmr.msra.gmra.mxu3 %vm31_vm0, %v22_v6  ;;  %125 = vmatmul.msk.f32.vlgmr.msra.gmra.mxu0 %vm31_vm0, %v21_v7  ;;  %v145_v21 = vld [vmem:[%s264_s4] ss:$0 sm:$0xff] }
   0xa   :  { %136 = vmatpush.msra.mxu2 %v67_v9  ;;  %93 = vmatpush.msra.mxu1 %v67_v9 }
   0xc   :  { %137 = vmatpush.msra.mxu2 %v66_v10  ;;  %94 = vmatpush.msra.mxu1 %v66_v10 }
   0xe   :  { %138 = vmatpush.msra.mxu2 %v65_v11  ;;  %95 = vmatpush.msra.mxu1 %v65_v11 }
  0x10   :  { %139 = vmatpush.msra.mxu2 %v64_v12  ;;  %96 = vmatpush.msra.mxu1 %v64_v12 }
  0x12   :  { %140 = vmatpush.msra.mxu2 %v63_v13  ;;  %97 = vmatpush.msra.mxu1 %v63_v13 }
  0x86   :  { %v55_v15 = vpop.f32.mrf.mxu0 }
  0x87   :  { %v56_v16 = vadd.f32 %v144_v14, %v55_v15 }
  0x89   :  { %v61_v17 = vmax.f32 %v56_v16, 0.0 }
  0x8b   :  { %127 = vmatmul.msk.f32.vlgmr.msra.gmra.mxu1 %vm75_vm1, %v61_v17 }
  0x8c   :  { %v58_v18 = vpop.f32.mrf.mxu3 }
  0x8d   :  { %v59_v19 = vadd.f32 %v144_v14, %v58_v18 }
  0x8f   :  { %v62_v20 = vmax.f32 %v59_v19, 0.0 }
  0x91   :  { %128 = vmatmul.msk.f32.vlgmr.msra.gmra.mxu2 %vm75_vm1, %v62_v20 }
 0x108   :  { %v99_v22 = vpop.f32.mrf.mxu1 }
 0x109   :  { %v100_v23 = vadd.f32 %v145_v21, %v99_v22 }
 0x10b   :  { %105 = vst.msk [vmem:[#allocation2] sm:$0xff] %vm31_vm0, %v100_v23 }
 0x114   :  { %v102_v24 = vpop.f32.mrf.mxu2 }
 0x115   :  { %v103_v25 = vadd.f32 %v145_v21, %v102_v24 }
 0x117   :  { %106 = vst.msk [vmem:[#allocation2 + $0x8] sm:$0xff] %vm31_vm0, %v103_v25 }
 0x118   :  { %119 = dma.vmem_to_hbm [thread:$0]  %s112_s23, 256, %s114_s25, [#allocation3], %s173_s26, %s173_s26, %s174_s27  }
 0x119   :  { %170 = dma.done.wait [#allocation3], 256  }
 0x11a   :  { %171 = vsyncadd [#allocation3], 4294967040 }
 0x11b   :  { %124 = vsyncpa [#allocation3], 1 }

</bundles_post_ra>
